<compile_context>
chip_gen: v7x
topology: tpu7x:2x2x1
jax: 0.10.0
libtpu: 0.0.40
codegen_flags: <defaults>
</compile_context>

<pallas_src>
from functools import partial

import numpy as np
import jax
import jax.numpy as jnp
from jax.experimental import pallas as pl
from jax.experimental.pallas import tpu as pltpu


# ------------------------------ Pallas kernel --------------------------------

def _basic_block_kernel(x_ref, oh_ref, ow_ref, w1_ref, bp_ref, g1_ref, be1_ref,
                        w2_ref, g2_ref, be2_ref, out_ref, *, ho, wo, eps, cdt):
    """Fused _BasicBlock forward in space-to-depth (parity-blocked) layout.

    x_ref  : (4, Cin_p, Q) f32    input parity blocks, Q = N*Ho*Wo on lanes
    oh/ow  : (1, Q) int32         window-row / window-col index per lane
    w1_ref : (2*Cout, 9*Cin_p)    conv1 taps + 1x1 projection (centre tap only)
    w2_ref : (Cout, 9*Cout)       conv2 taps
    bp/g1/be1/g2/be2 : (Cout, 1)  projection bias, BN affine parameters (f32)
    out_ref: (Cout, Q) f32        2x2-max-pooled block output (lane-dense)
    """
    f32 = jnp.float32
    cout = out_ref.shape[0]
    q = out_ref.shape[1]

    oh_vec = oh_ref[...]                       # (1, Q)
    ow_vec = ow_ref[...]                       # (1, Q)

    # Boundary masks for 'same' zero padding, built ONCE (shared by both convs;
    # Mosaic does not CSE them across the unrolled taps).
    base_h = {-1: oh_vec >= 1, 1: oh_vec < ho - 1}
    base_w = {-1: ow_vec >= 1, 1: ow_vec < wo - 1}
    masks = {}
    for soh in (-1, 0, 1):
        for sow in (-1, 0, 1):
            m = None
            if soh != 0:
                m = base_h[soh]
            if sow != 0:
                m = base_w[sow] if m is None else jnp.logical_and(m, base_w[sow])
            masks[(soh, sow)] = m

    def conv3x3(blocks, w_mat_ref):
        """'same' 3x3 conv over all four output parities as ONE MXU matmul.

        blocks: tuple of 4 (C, Q) f32 arrays (input spatial-parity blocks).
        Builds the (9*C, 4*Q) im2col operand in-kernel: each of the 16 distinct
        (source parity, shift) tap blocks is produced once via pltpu.roll +
        hoisted boundary mask, then reused for all 36 (output parity, tap)
        slots.  Returns w @ im2col with f32 accumulation.
        """
        cache = {}

        def tap(p_in, soh, sow):
            key = (p_in, soh, sow)
            if key not in cache:
                blk = blocks[p_in]
                delta = soh * wo + sow          # flat-q lane shift
                if delta % q != 0:
                    # want result[l] = blk[l + delta]; every wrapped lane
                    # (row wrap / cross-image wrap) is zeroed by the mask, so
                    # the lane rotation is exact.
                    blk = pltpu.roll(blk, (-delta) % q, axis=1)
                m = masks[(soh, sow)]
                if m is not None:
                    blk = jnp.where(m, blk, jnp.zeros_like(blk))
                cache[key] = blk
            return cache[key]

        lane_blocks = []
        for p in range(4):                      # output parity -> lane block
            ph, pw = p // 2, p % 2
            taps = []
            for kh in range(3):
                for kw in range(3):
                    a, b = ph + kh - 1, pw + kw - 1
                    soh, sow = a // 2, b // 2
                    p_in = 2 * (a - 2 * soh) + (b - 2 * sow)
                    taps.append(tap(p_in, soh, sow))
            lane_blocks.append(jnp.concatenate(taps, axis=0))   # (9*C, Q)
        im2col = jnp.concatenate(lane_blocks, axis=1)           # (9*C, 4*Q)
        # cast the whole slab once (no per-tap casts); f32-path cast is a no-op.
        return jnp.dot(w_mat_ref[...], im2col.astype(cdt),
                       preferred_element_type=f32)

    def batch_stats(y):
        """Single-pass training-mode BN stats (biased var) over all 4*Q lanes."""
        n_el = y.shape[-1]
        mean = jnp.sum(y, axis=-1, keepdims=True) / n_el
        var = jnp.sum(y * y, axis=-1, keepdims=True) / n_el - mean * mean
        return mean, jnp.maximum(var, 0.0)

    # ---- stage 1: conv1 (+ folded 1x1 projection), BN1, ReLU ----------------
    x_blocks = tuple(x_ref[p] for p in range(4))
    y1_aug = conv3x3(x_blocks, w1_ref)          # (2*Cout, 4*Q) f32
    y1 = y1_aug[:cout, :]                       # conv1 output rows
    res = y1_aug[cout:, :] + bp_ref[...]        # projection rows + bias
    # conv1/conv2 biases are intentionally omitted: training-mode BN subtracts
    # the per-channel mean, so a constant per-channel bias cancels exactly.

    mean1, var1 = batch_stats(y1)
    scale1 = g1_ref[...] * jax.lax.rsqrt(var1 + eps)
    shift1 = be1_ref[...] - mean1 * scale1
    z1 = jnp.maximum(y1 * scale1 + shift1, 0.0)             # (Cout, 4*Q) f32

    # ---- stage 2: conv2, BN2, + residual, ReLU, fused 2x2 max-pool ----------
    z1_blocks = tuple(z1[:, p * q:(p + 1) * q] for p in range(4))
    y2 = conv3x3(z1_blocks, w2_ref)             # (Cout, 4*Q) f32
    mean2, var2 = batch_stats(y2)
    scale2 = g2_ref[...] * jax.lax.rsqrt(var2 + eps)
    shift2 = be2_ref[...] - mean2 * scale2
    z2 = jnp.maximum(y2 * scale2 + shift2 + res, 0.0)

    # MaxPool2d(2, 2) == element-wise max over the four spatial-parity blocks.
    out_ref[...] = jnp.maximum(
        jnp.maximum(z2[:, 0 * q:1 * q], z2[:, 1 * q:2 * q]),
        jnp.maximum(z2[:, 2 * q:3 * q], z2[:, 3 * q:4 * q]))


# ------------------------------- JAX wrapper ----------------------------------

def basic_block_forward(x_nchw, params, *, eps=1e-5, compute_dtype=jnp.float32):
    """Pallas forward for _BasicBlock(in_ch, out_ch, b_norm=True, max_pooling=True, p=None)."""
    N, Cin, H, W = x_nchw.shape
    Cout = params["w1"].shape[0]
    assert H % 2 == 0 and W % 2 == 0, "2x2 max-pool layout needs even H and W"
    Ho, Wo = H // 2, W // 2
    Q = N * Ho * Wo
    cin_p = ((Cin + 7) // 8) * 8     # pad input channels to a full sublane tile

    x = x_nchw.astype(jnp.float32)
    # Space-to-depth layout: xP[2*(h%2)+(w%2), ci, (n, h//2, w//2)]  (Q on lanes).
    xP = x.reshape(N, Cin, Ho, 2, Wo, 2).transpose(3, 5, 1, 0, 2, 4).reshape(4, Cin, Q)
    xP = jnp.pad(xP, ((0, 0), (0, cin_p - Cin), (0, 0)))       # no lane halo

    # Window coordinates per lane (avoids integer div/rem inside the kernel).
    q_ids = jnp.arange(Q, dtype=jnp.int32)
    ow_vec = (q_ids % Wo).reshape(1, Q)
    oh_vec = ((q_ids // Wo) % Ho).reshape(1, Q)

    # conv1 weight as (Cout, 9*cin_p), K ordered tap-major / channel-minor; the
    # 1x1 projection rides along as Cout extra output rows touching only the
    # centre tap (tap index 4 = kh=kw=1, which is the unshifted parity block).
    w1_taps = jnp.transpose(params["w1"], (2, 3, 0, 1)).reshape(9, Cout, Cin)
    w1_taps = jnp.pad(w1_taps, ((0, 0), (0, 0), (0, cin_p - Cin)))
    w1_mat = jnp.transpose(w1_taps, (1, 0, 2)).reshape(Cout, 9 * cin_p)
    wp_mat = (jnp.zeros((Cout, 9, cin_p), jnp.float32)
              .at[:, 4, :Cin].set(params["wp"][:, :, 0, 0])
              .reshape(Cout, 9 * cin_p))
    w1_aug = jnp.concatenate([w1_mat, wp_mat], axis=0).astype(compute_dtype)

    w2_taps = jnp.transpose(params["w2"], (2, 3, 0, 1)).reshape(9, Cout, Cout)
    w2_mat = (jnp.transpose(w2_taps, (1, 0, 2))
              .reshape(Cout, 9 * Cout).astype(compute_dtype))

    col = lambda v: v.reshape(Cout, 1).astype(jnp.float32)
    args = (xP, oh_vec, ow_vec, w1_aug, col(params["bp"]),
            col(params["g1"]), col(params["be1"]),
            w2_mat, col(params["g2"]), col(params["be2"]))

    flops = int(2 * (2 * Cout) * (9 * cin_p) * (4 * Q)
                + 2 * Cout * (9 * Cout) * (4 * Q)
                + 40 * Cout * Q)
    bytes_accessed = int(sum(int(np.prod(a.shape)) * a.dtype.itemsize for a in args)
                         + Cout * Q * 4)

    out = pl.pallas_call(
        partial(_basic_block_kernel, ho=Ho, wo=Wo, eps=eps, cdt=compute_dtype),
        out_shape=jax.ShapeDtypeStruct((Cout, Q), jnp.float32),
        in_specs=[pl.BlockSpec(memory_space=pltpu.MemorySpace.VMEM)] * len(args),
        out_specs=pl.BlockSpec(memory_space=pltpu.MemorySpace.VMEM),
        cost_estimate=pl.CostEstimate(flops=flops, transcendentals=2 * Cout,
                                      bytes_accessed=bytes_accessed),
        compiler_params=pltpu.CompilerParams(vmem_limit_bytes=4 * 1024 * 1024),
    )(*args)

    # TODO(synk): for realistic H*W, grid this kernel over Q with per-tile
    # sum/sumsq accumulators and a two-pass (stats + apply) BN so the Q axis can
    # be "parallel" across v7x's two TensorCores; at Q=128 one call is optimal.
    # TODO(synk): Dropout2d is skipped because the module is built with p=None;
    # if enabled it would use pltpu.prng_seed + pltpu.prng_random_bits for the
    # per-channel masks.
    # If blocks are chained, keep the (parity, C, Q) layout between blocks
    # instead of this NCHW round-trip (done here only to compare vs reference).
    return jnp.transpose(out.reshape(Cout, N, Ho, Wo), (1, 0, 2, 3))


# --------------------------- pure-JAX reference -------------------------------

def reference_forward(x, p, eps=1e-5):
    conv = lambda x_, w, b: jax.lax.conv_general_dilated(
        x_, w, (1, 1), "SAME", dimension_numbers=("NCHW", "OIHW", "NCHW"),
        precision=jax.lax.Precision.HIGHEST) + b[None, :, None, None]

    def bn(x_, g, be):
        mean = x_.mean(axis=(0, 2, 3), keepdims=True)
        var = ((x_ - mean) ** 2).mean(axis=(0, 2, 3), keepdims=True)
        return (x_ - mean) * jax.lax.rsqrt(var + eps) * g[None, :, None, None] \
            + be[None, :, None, None]

    residual = conv(x, p["wp"], p["bp"])
    h = jnp.maximum(bn(conv(x, p["w1"], p["b1"]), p["g1"], p["be1"]), 0.0)
    h = jnp.maximum(bn(conv(h, p["w2"], p["b2"]), p["g2"], p["be2"]) + residual, 0.0)
    N, C, H, W = h.shape
    return h.reshape(N, C, H // 2, 2, W // 2, 2).max(axis=(3, 5))


# ----------------------------------- main --------------------------------------

def init_params(key, cin, cout):
    def conv_init(k, co, ci, kh, kw):
        bound = 1.0 / np.sqrt(ci * kh * kw)
        kw_, kb_ = jax.random.split(k)
        w = jax.random.uniform(kw_, (co, ci, kh, kw), minval=-bound, maxval=bound,
                               dtype=jnp.float32)
        b = jax.random.uniform(kb_, (co,), minval=-bound, maxval=bound,
                               dtype=jnp.float32)
        return w, b

    k1, k2, k3 = jax.random.split(key, 3)
    w1, b1 = conv_init(k1, cout, cin, 3, 3)
    w2, b2 = conv_init(k2, cout, cout, 3, 3)
    wp, bp = conv_init(k3, cout, cin, 1, 1)
    return {
        "w1": w1, "b1": b1, "w2": w2, "b2": b2, "wp": wp, "bp": bp,
        "g1": jnp.ones((cout,), jnp.float32), "be1": jnp.zeros((cout,), jnp.float32),
        "g2": jnp.ones((cout,), jnp.float32), "be2": jnp.zeros((cout,), jnp.float32),
    }


if __name__ == "__main__":
    key = jax.random.PRNGKey(0)
    kx, kp = jax.random.split(key)

    N, Cin, Cout, H, W = 2, 4, 8, 16, 16
    x = jax.random.normal(kx, (N, Cin, H, W), dtype=jnp.float32)
    params = init_params(kp, Cin, Cout)

    ref = jax.block_until_ready(reference_forward(x, params))

    # f32 MXU operands: safe default everywhere (incl. v5e's non-bf16 VPU/EUP).
    out = jax.block_until_ready(basic_block_forward(x, params))
    assert out.shape == (N, Cout, H // 2, W // 2), out.shape
    if not np.allclose(np.asarray(out), np.asarray(ref), atol=5e-2, rtol=5e-2):
        raise AssertionError("Pallas (f32) output does not match reference")

    # bf16 MXU operands: v6e/v7x fast path (mask/roll/BN/element-wise stay f32).
    out_bf16 = jax.block_until_ready(
        basic_block_forward(x, params, compute_dtype=jnp.bfloat16))
    if not np.allclose(np.asarray(out_bf16), np.asarray(ref), atol=1e-1, rtol=1e-1):
        raise AssertionError("Pallas (bf16) output does not match reference")

    print("KERNEL_OK")
</pallas_src>

<mosaic_0001>
module attributes {stable_mosaic.version = 11 : i64} {
  func.func @_basic_block_kernel(%arg0: memref<4x8x128xf32, #tpu.memory_space<vmem>>, %arg1: memref<1x128xi32, #tpu.memory_space<vmem>>, %arg2: memref<1x128xi32, #tpu.memory_space<vmem>>, %arg3: memref<16x72xf32, #tpu.memory_space<vmem>>, %arg4: memref<8x1xf32, #tpu.memory_space<vmem>>, %arg5: memref<8x1xf32, #tpu.memory_space<vmem>>, %arg6: memref<8x1xf32, #tpu.memory_space<vmem>>, %arg7: memref<8x72xf32, #tpu.memory_space<vmem>>, %arg8: memref<8x1xf32, #tpu.memory_space<vmem>>, %arg9: memref<8x1xf32, #tpu.memory_space<vmem>>, %arg10: memref<8x128xf32, #tpu.memory_space<vmem>>) attributes {dimension_semantics = [], scalar_prefetch = 0 : i64, scratch_operands = 0 : i64, tpu.core_type = #tpu.core_type<tc>} {
    %c0 = arith.constant 0 : index
    %c0_0 = arith.constant 0 : index
    %0 = vector.load %arg1[%c0, %c0_0] : memref<1x128xi32, #tpu.memory_space<vmem>>, vector<1x128xi32>
    %c0_1 = arith.constant 0 : index
    %c0_2 = arith.constant 0 : index
    %1 = vector.load %arg2[%c0_1, %c0_2] : memref<1x128xi32, #tpu.memory_space<vmem>>, vector<1x128xi32>
    %c1_i32 = arith.constant 1 : i32
    %2 = vector.broadcast %c1_i32 : i32 to vector<1x128xi32>
    %3 = arith.cmpi sge, %0, %2 : vector<1x128xi32>
    %c7_i32 = arith.constant 7 : i32
    %4 = vector.broadcast %c7_i32 : i32 to vector<1x128xi32>
    %5 = arith.cmpi slt, %0, %4 : vector<1x128xi32>
    %c1_i32_3 = arith.constant 1 : i32
    %6 = vector.broadcast %c1_i32_3 : i32 to vector<1x128xi32>
    %7 = arith.cmpi sge, %1, %6 : vector<1x128xi32>
    %c7_i32_4 = arith.constant 7 : i32
    %8 = vector.broadcast %c7_i32_4 : i32 to vector<1x128xi32>
    %9 = arith.cmpi slt, %1, %8 : vector<1x128xi32>
    %10 = arith.andi %3, %7 : vector<1x128xi1>
    %11 = arith.andi %3, %9 : vector<1x128xi1>
    %12 = arith.andi %5, %7 : vector<1x128xi1>
    %13 = arith.andi %5, %9 : vector<1x128xi1>
    %c0_5 = arith.constant 0 : index
    %c0_6 = arith.constant 0 : index
    %c0_7 = arith.constant 0 : index
    %14 = vector.load %arg0[%c0_5, %c0_6, %c0_7] : memref<4x8x128xf32, #tpu.memory_space<vmem>>, vector<1x8x128xf32>
    %15 = vector.shape_cast %14 : vector<1x8x128xf32> to vector<8x128xf32>
    %c1 = arith.constant 1 : index
    %c0_8 = arith.constant 0 : index
    %c0_9 = arith.constant 0 : index
    %16 = vector.load %arg0[%c1, %c0_8, %c0_9] : memref<4x8x128xf32, #tpu.memory_space<vmem>>, vector<1x8x128xf32>
    %17 = vector.shape_cast %16 : vector<1x8x128xf32> to vector<8x128xf32>
    %c2 = arith.constant 2 : index
    %c0_10 = arith.constant 0 : index
    %c0_11 = arith.constant 0 : index
    %18 = vector.load %arg0[%c2, %c0_10, %c0_11] : memref<4x8x128xf32, #tpu.memory_space<vmem>>, vector<1x8x128xf32>
    %19 = vector.shape_cast %18 : vector<1x8x128xf32> to vector<8x128xf32>
    %c3 = arith.constant 3 : index
    %c0_12 = arith.constant 0 : index
    %c0_13 = arith.constant 0 : index
    %20 = vector.load %arg0[%c3, %c0_12, %c0_13] : memref<4x8x128xf32, #tpu.memory_space<vmem>>, vector<1x8x128xf32>
    %21 = vector.shape_cast %20 : vector<1x8x128xf32> to vector<8x128xf32>
    %c9_i32 = arith.constant 9 : i32
    %22 = tpu.dynamic_rotate %21 by %c9_i32 dim 1 : vector<8x128xf32>, i32 -> vector<8x128xf32>
    %cst = arith.constant 0.000000e+00 : f32
    %23 = vector.broadcast %cst : f32 to vector<8x128xf32>
    %24 = vector.shape_cast %10 : vector<1x128xi1> to vector<1x128xi1>
    %25 = vector.broadcast %24 : vector<1x128xi1> to vector<8x128xi1>
    %26 = arith.select %25, %22, %23 : vector<8x128xi1>, vector<8x128xf32>
    %c8_i32 = arith.constant 8 : i32
    %27 = tpu.dynamic_rotate %19 by %c8_i32 dim 1 : vector<8x128xf32>, i32 -> vector<8x128xf32>
    %cst_14 = arith.constant 0.000000e+00 : f32
    %28 = vector.broadcast %cst_14 : f32 to vector<8x128xf32>
    %29 = vector.shape_cast %3 : vector<1x128xi1> to vector<1x128xi1>
    %30 = vector.broadcast %29 : vector<1x128xi1> to vector<8x128xi1>
    %31 = arith.select %30, %27, %28 : vector<8x128xi1>, vector<8x128xf32>
    %c8_i32_15 = arith.constant 8 : i32
    %32 = tpu.dynamic_rotate %21 by %c8_i32_15 dim 1 : vector<8x128xf32>, i32 -> vector<8x128xf32>
    %cst_16 = arith.constant 0.000000e+00 : f32
    %33 = vector.broadcast %cst_16 : f32 to vector<8x128xf32>
    %34 = vector.shape_cast %3 : vector<1x128xi1> to vector<1x128xi1>
    %35 = vector.broadcast %34 : vector<1x128xi1> to vector<8x128xi1>
    %36 = arith.select %35, %32, %33 : vector<8x128xi1>, vector<8x128xf32>
    %c1_i32_17 = arith.constant 1 : i32
    %37 = tpu.dynamic_rotate %17 by %c1_i32_17 dim 1 : vector<8x128xf32>, i32 -> vector<8x128xf32>
    %cst_18 = arith.constant 0.000000e+00 : f32
    %38 = vector.broadcast %cst_18 : f32 to vector<8x128xf32>
    %39 = vector.shape_cast %7 : vector<1x128xi1> to vector<1x128xi1>
    %40 = vector.broadcast %39 : vector<1x128xi1> to vector<8x128xi1>
    %41 = arith.select %40, %37, %38 : vector<8x128xi1>, vector<8x128xf32>
    %c1_i32_19 = arith.constant 1 : i32
    %42 = tpu.dynamic_rotate %21 by %c1_i32_19 dim 1 : vector<8x128xf32>, i32 -> vector<8x128xf32>
    %cst_20 = arith.constant 0.000000e+00 : f32
    %43 = vector.broadcast %cst_20 : f32 to vector<8x128xf32>
    %44 = vector.shape_cast %7 : vector<1x128xi1> to vector<1x128xi1>
    %45 = vector.broadcast %44 : vector<1x128xi1> to vector<8x128xi1>
    %46 = arith.select %45, %42, %43 : vector<8x128xi1>, vector<8x128xf32>
    %47 = tpu.concatenate %26, %31, %36, %41, %15, %17, %46, %19, %21 in 0 : vector<8x128xf32>, vector<8x128xf32>, vector<8x128xf32>, vector<8x128xf32>, vector<8x128xf32>, vector<8x128xf32>, vector<8x128xf32>, vector<8x128xf32>, vector<8x128xf32> -> vector<72x128xf32>
    %c7_i32_21 = arith.constant 7 : i32
    %48 = tpu.dynamic_rotate %19 by %c7_i32_21 dim 1 : vector<8x128xf32>, i32 -> vector<8x128xf32>
    %cst_22 = arith.constant 0.000000e+00 : f32
    %49 = vector.broadcast %cst_22 : f32 to vector<8x128xf32>
    %50 = vector.shape_cast %11 : vector<1x128xi1> to vector<1x128xi1>
    %51 = vector.broadcast %50 : vector<1x128xi1> to vector<8x128xi1>
    %52 = arith.select %51, %48, %49 : vector<8x128xi1>, vector<8x128xf32>
    %c127_i32 = arith.constant 127 : i32
    %53 = tpu.dynamic_rotate %15 by %c127_i32 dim 1 : vector<8x128xf32>, i32 -> vector<8x128xf32>
    %cst_23 = arith.constant 0.000000e+00 : f32
    %54 = vector.broadcast %cst_23 : f32 to vector<8x128xf32>
    %55 = vector.shape_cast %9 : vector<1x128xi1> to vector<1x128xi1>
    %56 = vector.broadcast %55 : vector<1x128xi1> to vector<8x128xi1>
    %57 = arith.select %56, %53, %54 : vector<8x128xi1>, vector<8x128xf32>
    %c127_i32_24 = arith.constant 127 : i32
    %58 = tpu.dynamic_rotate %19 by %c127_i32_24 dim 1 : vector<8x128xf32>, i32 -> vector<8x128xf32>
    %cst_25 = arith.constant 0.000000e+00 : f32
    %59 = vector.broadcast %cst_25 : f32 to vector<8x128xf32>
    %60 = vector.shape_cast %9 : vector<1x128xi1> to vector<1x128xi1>
    %61 = vector.broadcast %60 : vector<1x128xi1> to vector<8x128xi1>
    %62 = arith.select %61, %58, %59 : vector<8x128xi1>, vector<8x128xf32>
    %63 = tpu.concatenate %31, %36, %52, %15, %17, %57, %19, %21, %62 in 0 : vector<8x128xf32>, vector<8x128xf32>, vector<8x128xf32>, vector<8x128xf32>, vector<8x128xf32>, vector<8x128xf32>, vector<8x128xf32>, vector<8x128xf32>, vector<8x128xf32> -> vector<72x128xf32>
    %c121_i32 = arith.constant 121 : i32
    %64 = tpu.dynamic_rotate %17 by %c121_i32 dim 1 : vector<8x128xf32>, i32 -> vector<8x128xf32>
    %cst_26 = arith.constant 0.000000e+00 : f32
    %65 = vector.broadcast %cst_26 : f32 to vector<8x128xf32>
    %66 = vector.shape_cast %12 : vector<1x128xi1> to vector<1x128xi1>
    %67 = vector.broadcast %66 : vector<1x128xi1> to vector<8x128xi1>
    %68 = arith.select %67, %64, %65 : vector<8x128xi1>, vector<8x128xf32>
    %c120_i32 = arith.constant 120 : i32
    %69 = tpu.dynamic_rotate %15 by %c120_i32 dim 1 : vector<8x128xf32>, i32 -> vector<8x128xf32>
    %cst_27 = arith.constant 0.000000e+00 : f32
    %70 = vector.broadcast %cst_27 : f32 to vector<8x128xf32>
    %71 = vector.shape_cast %5 : vector<1x128xi1> to vector<1x128xi1>
    %72 = vector.broadcast %71 : vector<1x128xi1> to vector<8x128xi1>
    %73 = arith.select %72, %69, %70 : vector<8x128xi1>, vector<8x128xf32>
    %c120_i32_28 = arith.constant 120 : i32
    %74 = tpu.dynamic_rotate %17 by %c120_i32_28 dim 1 : vector<8x128xf32>, i32 -> vector<8x128xf32>
    %cst_29 = arith.constant 0.000000e+00 : f32
    %75 = vector.broadcast %cst_29 : f32 to vector<8x128xf32>
    %76 = vector.shape_cast %5 : vector<1x128xi1> to vector<1x128xi1>
    %77 = vector.broadcast %76 : vector<1x128xi1> to vector<8x128xi1>
    %78 = arith.select %77, %74, %75 : vector<8x128xi1>, vector<8x128xf32>
    %79 = tpu.concatenate %41, %15, %17, %46, %19, %21, %68, %73, %78 in 0 : vector<8x128xf32>, vector<8x128xf32>, vector<8x128xf32>, vector<8x128xf32>, vector<8x128xf32>, vector<8x128xf32>, vector<8x128xf32>, vector<8x128xf32>, vector<8x128xf32> -> vector<72x128xf32>
    %c119_i32 = arith.constant 119 : i32
    %80 = tpu.dynamic_rotate %15 by %c119_i32 dim 1 : vector<8x128xf32>, i32 -> vector<8x128xf32>
    %cst_30 = arith.constant 0.000000e+00 : f32
    %81 = vector.broadcast %cst_30 : f32 to vector<8x128xf32>
    %82 = vector.shape_cast %13 : vector<1x128xi1> to vector<1x128xi1>
    %83 = vector.broadcast %82 : vector<1x128xi1> to vector<8x128xi1>
    %84 = arith.select %83, %80, %81 : vector<8x128xi1>, vector<8x128xf32>
    %85 = tpu.concatenate %15, %17, %57, %19, %21, %62, %73, %78, %84 in 0 : vector<8x128xf32>, vector<8x128xf32>, vector<8x128xf32>, vector<8x128xf32>, vector<8x128xf32>, vector<8x128xf32>, vector<8x128xf32>, vector<8x128xf32>, vector<8x128xf32> -> vector<72x128xf32>
    %86 = tpu.concatenate %47, %63, %79, %85 in 1 : vector<72x128xf32>, vector<72x128xf32>, vector<72x128xf32>, vector<72x128xf32> -> vector<72x512xf32>
    %c0_31 = arith.constant 0 : index
    %c0_32 = arith.constant 0 : index
    %87 = vector.load %arg3[%c0_31, %c0_32] : memref<16x72xf32, #tpu.memory_space<vmem>>, vector<16x72xf32>
    %cst_33 = arith.constant dense<0.000000e+00> : vector<16x512xf32>
    %88 = tpu.matmul %87, %86, %cst_33 {dimension_numbers = #tpu.dot_dimension_numbers<[1], [0], [0], [1], [0, 0, 1, 1], [], []>} : vector<16x72xf32>, vector<72x512xf32>, vector<16x512xf32> -> vector<16x512xf32>
    %89 = vector.extract_strided_slice %88 {offsets = [0, 0], sizes = [8, 512], strides = [1, 1]} : vector<16x512xf32> to vector<8x512xf32>
    %90 = vector.extract_strided_slice %88 {offsets = [8, 0], sizes = [8, 512], strides = [1, 1]} : vector<16x512xf32> to vector<8x512xf32>
    %c0_34 = arith.constant 0 : index
    %c0_35 = arith.constant 0 : index
    %91 = vector.load %arg4[%c0_34, %c0_35] : memref<8x1xf32, #tpu.memory_space<vmem>>, vector<8x1xf32>
    %92 = vector.broadcast %91 : vector<8x1xf32> to vector<8x512xf32>
    %93 = arith.addf %90, %92 : vector<8x512xf32>
    %cst_36 = arith.constant dense<0.000000e+00> : vector<8xf32>
    %94 = vector.multi_reduction <add>, %89, %cst_36 [1] : vector<8x512xf32> to vector<8xf32>
    %95 = vector.shape_cast %94 : vector<8xf32> to vector<8x1xf32>
    %cst_37 = arith.constant 5.120000e+02 : f32
    %96 = vector.broadcast %cst_37 : f32 to vector<8x1xf32>
    %97 = arith.divf %95, %96 : vector<8x1xf32>
    %98 = arith.mulf %89, %89 : vector<8x512xf32>
    %cst_38 = arith.constant dense<0.000000e+00> : vector<8xf32>
    %99 = vector.multi_reduction <add>, %98, %cst_38 [1] : vector<8x512xf32> to vector<8xf32>
    %100 = vector.shape_cast %99 : vector<8xf32> to vector<8x1xf32>
    %cst_39 = arith.constant 5.120000e+02 : f32
    %101 = vector.broadcast %cst_39 : f32 to vector<8x1xf32>
    %102 = arith.divf %100, %101 : vector<8x1xf32>
    %103 = arith.mulf %97, %97 : vector<8x1xf32>
    %104 = arith.subf %102, %103 : vector<8x1xf32>
    %cst_40 = arith.constant 0.000000e+00 : f32
    %105 = vector.broadcast %cst_40 : f32 to vector<8x1xf32>
    %106 = arith.maximumf %104, %105 : vector<8x1xf32>
    %c0_41 = arith.constant 0 : index
    %c0_42 = arith.constant 0 : index
    %107 = vector.load %arg5[%c0_41, %c0_42] : memref<8x1xf32, #tpu.memory_space<vmem>>, vector<8x1xf32>
    %cst_43 = arith.constant 9.99999974E-6 : f32
    %108 = vector.broadcast %cst_43 : f32 to vector<8x1xf32>
    %109 = arith.addf %106, %108 : vector<8x1xf32>
    %110 = math.rsqrt %109 : vector<8x1xf32>
    %111 = arith.mulf %107, %110 : vector<8x1xf32>
    %c0_44 = arith.constant 0 : index
    %c0_45 = arith.constant 0 : index
    %112 = vector.load %arg6[%c0_44, %c0_45] : memref<8x1xf32, #tpu.memory_space<vmem>>, vector<8x1xf32>
    %113 = arith.mulf %97, %111 : vector<8x1xf32>
    %114 = arith.subf %112, %113 : vector<8x1xf32>
    %115 = vector.broadcast %111 : vector<8x1xf32> to vector<8x512xf32>
    %116 = arith.mulf %89, %115 : vector<8x512xf32>
    %117 = vector.broadcast %114 : vector<8x1xf32> to vector<8x512xf32>
    %118 = arith.addf %116, %117 : vector<8x512xf32>
    %cst_46 = arith.constant 0.000000e+00 : f32
    %119 = vector.broadcast %cst_46 : f32 to vector<8x512xf32>
    %120 = arith.maximumf %118, %119 : vector<8x512xf32>
    %121 = vector.extract_strided_slice %120 {offsets = [0, 0], sizes = [8, 128], strides = [1, 1]} : vector<8x512xf32> to vector<8x128xf32>
    %122 = vector.extract_strided_slice %120 {offsets = [0, 128], sizes = [8, 128], strides = [1, 1]} : vector<8x512xf32> to vector<8x128xf32>
    %123 = vector.extract_strided_slice %120 {offsets = [0, 256], sizes = [8, 128], strides = [1, 1]} : vector<8x512xf32> to vector<8x128xf32>
    %124 = vector.extract_strided_slice %120 {offsets = [0, 384], sizes = [8, 128], strides = [1, 1]} : vector<8x512xf32> to vector<8x128xf32>
    %c9_i32_47 = arith.constant 9 : i32
    %125 = tpu.dynamic_rotate %124 by %c9_i32_47 dim 1 : vector<8x128xf32>, i32 -> vector<8x128xf32>
    %cst_48 = arith.constant 0.000000e+00 : f32
    %126 = vector.broadcast %cst_48 : f32 to vector<8x128xf32>
    %127 = vector.shape_cast %10 : vector<1x128xi1> to vector<1x128xi1>
    %128 = vector.broadcast %127 : vector<1x128xi1> to vector<8x128xi1>
    %129 = arith.select %128, %125, %126 : vector<8x128xi1>, vector<8x128xf32>
    %c8_i32_49 = arith.constant 8 : i32
    %130 = tpu.dynamic_rotate %123 by %c8_i32_49 dim 1 : vector<8x128xf32>, i32 -> vector<8x128xf32>
    %cst_50 = arith.constant 0.000000e+00 : f32
    %131 = vector.broadcast %cst_50 : f32 to vector<8x128xf32>
    %132 = vector.shape_cast %3 : vector<1x128xi1> to vector<1x128xi1>
    %133 = vector.broadcast %132 : vector<1x128xi1> to vector<8x128xi1>
    %134 = arith.select %133, %130, %131 : vector<8x128xi1>, vector<8x128xf32>
    %c8_i32_51 = arith.constant 8 : i32
    %135 = tpu.dynamic_rotate %124 by %c8_i32_51 dim 1 : vector<8x128xf32>, i32 -> vector<8x128xf32>
    %cst_52 = arith.constant 0.000000e+00 : f32
    %136 = vector.broadcast %cst_52 : f32 to vector<8x128xf32>
    %137 = vector.shape_cast %3 : vector<1x128xi1> to vector<1x128xi1>
    %138 = vector.broadcast %137 : vector<1x128xi1> to vector<8x128xi1>
    %139 = arith.select %138, %135, %136 : vector<8x128xi1>, vector<8x128xf32>
    %c1_i32_53 = arith.constant 1 : i32
    %140 = tpu.dynamic_rotate %122 by %c1_i32_53 dim 1 : vector<8x128xf32>, i32 -> vector<8x128xf32>
    %cst_54 = arith.constant 0.000000e+00 : f32
    %141 = vector.broadcast %cst_54 : f32 to vector<8x128xf32>
    %142 = vector.shape_cast %7 : vector<1x128xi1> to vector<1x128xi1>
    %143 = vector.broadcast %142 : vector<1x128xi1> to vector<8x128xi1>
    %144 = arith.select %143, %140, %141 : vector<8x128xi1>, vector<8x128xf32>
    %c1_i32_55 = arith.constant 1 : i32
    %145 = tpu.dynamic_rotate %124 by %c1_i32_55 dim 1 : vector<8x128xf32>, i32 -> vector<8x128xf32>
    %cst_56 = arith.constant 0.000000e+00 : f32
    %146 = vector.broadcast %cst_56 : f32 to vector<8x128xf32>
    %147 = vector.shape_cast %7 : vector<1x128xi1> to vector<1x128xi1>
    %148 = vector.broadcast %147 : vector<1x128xi1> to vector<8x128xi1>
    %149 = arith.select %148, %145, %146 : vector<8x128xi1>, vector<8x128xf32>
    %150 = tpu.concatenate %129, %134, %139, %144, %121, %122, %149, %123, %124 in 0 : vector<8x128xf32>, vector<8x128xf32>, vector<8x128xf32>, vector<8x128xf32>, vector<8x128xf32>, vector<8x128xf32>, vector<8x128xf32>, vector<8x128xf32>, vector<8x128xf32> -> vector<72x128xf32>
    %c7_i32_57 = arith.constant 7 : i32
    %151 = tpu.dynamic_rotate %123 by %c7_i32_57 dim 1 : vector<8x128xf32>, i32 -> vector<8x128xf32>
    %cst_58 = arith.constant 0.000000e+00 : f32
    %152 = vector.broadcast %cst_58 : f32 to vector<8x128xf32>
    %153 = vector.shape_cast %11 : vector<1x128xi1> to vector<1x128xi1>
    %154 = vector.broadcast %153 : vector<1x128xi1> to vector<8x128xi1>
    %155 = arith.select %154, %151, %152 : vector<8x128xi1>, vector<8x128xf32>
    %c127_i32_59 = arith.constant 127 : i32
    %156 = tpu.dynamic_rotate %121 by %c127_i32_59 dim 1 : vector<8x128xf32>, i32 -> vector<8x128xf32>
    %cst_60 = arith.constant 0.000000e+00 : f32
    %157 = vector.broadcast %cst_60 : f32 to vector<8x128xf32>
    %158 = vector.shape_cast %9 : vector<1x128xi1> to vector<1x128xi1>
    %159 = vector.broadcast %158 : vector<1x128xi1> to vector<8x128xi1>
    %160 = arith.select %159, %156, %157 : vector<8x128xi1>, vector<8x128xf32>
    %c127_i32_61 = arith.constant 127 : i32
    %161 = tpu.dynamic_rotate %123 by %c127_i32_61 dim 1 : vector<8x128xf32>, i32 -> vector<8x128xf32>
    %cst_62 = arith.constant 0.000000e+00 : f32
    %162 = vector.broadcast %cst_62 : f32 to vector<8x128xf32>
    %163 = vector.shape_cast %9 : vector<1x128xi1> to vector<1x128xi1>
    %164 = vector.broadcast %163 : vector<1x128xi1> to vector<8x128xi1>
    %165 = arith.select %164, %161, %162 : vector<8x128xi1>, vector<8x128xf32>
    %166 = tpu.concatenate %134, %139, %155, %121, %122, %160, %123, %124, %165 in 0 : vector<8x128xf32>, vector<8x128xf32>, vector<8x128xf32>, vector<8x128xf32>, vector<8x128xf32>, vector<8x128xf32>, vector<8x128xf32>, vector<8x128xf32>, vector<8x128xf32> -> vector<72x128xf32>
    %c121_i32_63 = arith.constant 121 : i32
    %167 = tpu.dynamic_rotate %122 by %c121_i32_63 dim 1 : vector<8x128xf32>, i32 -> vector<8x128xf32>
    %cst_64 = arith.constant 0.000000e+00 : f32
    %168 = vector.broadcast %cst_64 : f32 to vector<8x128xf32>
    %169 = vector.shape_cast %12 : vector<1x128xi1> to vector<1x128xi1>
    %170 = vector.broadcast %169 : vector<1x128xi1> to vector<8x128xi1>
    %171 = arith.select %170, %167, %168 : vector<8x128xi1>, vector<8x128xf32>
    %c120_i32_65 = arith.constant 120 : i32
    %172 = tpu.dynamic_rotate %121 by %c120_i32_65 dim 1 : vector<8x128xf32>, i32 -> vector<8x128xf32>
    %cst_66 = arith.constant 0.000000e+00 : f32
    %173 = vector.broadcast %cst_66 : f32 to vector<8x128xf32>
    %174 = vector.shape_cast %5 : vector<1x128xi1> to vector<1x128xi1>
    %175 = vector.broadcast %174 : vector<1x128xi1> to vector<8x128xi1>
    %176 = arith.select %175, %172, %173 : vector<8x128xi1>, vector<8x128xf32>
    %c120_i32_67 = arith.constant 120 : i32
    %177 = tpu.dynamic_rotate %122 by %c120_i32_67 dim 1 : vector<8x128xf32>, i32 -> vector<8x128xf32>
    %cst_68 = arith.constant 0.000000e+00 : f32
    %178 = vector.broadcast %cst_68 : f32 to vector<8x128xf32>
    %179 = vector.shape_cast %5 : vector<1x128xi1> to vector<1x128xi1>
    %180 = vector.broadcast %179 : vector<1x128xi1> to vector<8x128xi1>
    %181 = arith.select %180, %177, %178 : vector<8x128xi1>, vector<8x128xf32>
    %182 = tpu.concatenate %144, %121, %122, %149, %123, %124, %171, %176, %181 in 0 : vector<8x128xf32>, vector<8x128xf32>, vector<8x128xf32>, vector<8x128xf32>, vector<8x128xf32>, vector<8x128xf32>, vector<8x128xf32>, vector<8x128xf32>, vector<8x128xf32> -> vector<72x128xf32>
    %c119_i32_69 = arith.constant 119 : i32
    %183 = tpu.dynamic_rotate %121 by %c119_i32_69 dim 1 : vector<8x128xf32>, i32 -> vector<8x128xf32>
    %cst_70 = arith.constant 0.000000e+00 : f32
    %184 = vector.broadcast %cst_70 : f32 to vector<8x128xf32>
    %185 = vector.shape_cast %13 : vector<1x128xi1> to vector<1x128xi1>
    %186 = vector.broadcast %185 : vector<1x128xi1> to vector<8x128xi1>
    %187 = arith.select %186, %183, %184 : vector<8x128xi1>, vector<8x128xf32>
    %188 = tpu.concatenate %121, %122, %160, %123, %124, %165, %176, %181, %187 in 0 : vector<8x128xf32>, vector<8x128xf32>, vector<8x128xf32>, vector<8x128xf32>, vector<8x128xf32>, vector<8x128xf32>, vector<8x128xf32>, vector<8x128xf32>, vector<8x128xf32> -> vector<72x128xf32>
    %189 = tpu.concatenate %150, %166, %182, %188 in 1 : vector<72x128xf32>, vector<72x128xf32>, vector<72x128xf32>, vector<72x128xf32> -> vector<72x512xf32>
    %c0_71 = arith.constant 0 : index
    %c0_72 = arith.constant 0 : index
    %190 = vector.load %arg7[%c0_71, %c0_72] : memref<8x72xf32, #tpu.memory_space<vmem>>, vector<8x72xf32>
    %cst_73 = arith.constant dense<0.000000e+00> : vector<8x512xf32>
    %191 = tpu.matmul %190, %189, %cst_73 {dimension_numbers = #tpu.dot_dimension_numbers<[1], [0], [0], [1], [0, 0, 1, 1], [], []>} : vector<8x72xf32>, vector<72x512xf32>, vector<8x512xf32> -> vector<8x512xf32>
    %cst_74 = arith.constant dense<0.000000e+00> : vector<8xf32>
    %192 = vector.multi_reduction <add>, %191, %cst_74 [1] : vector<8x512xf32> to vector<8xf32>
    %193 = vector.shape_cast %192 : vector<8xf32> to vector<8x1xf32>
    %cst_75 = arith.constant 5.120000e+02 : f32
    %194 = vector.broadcast %cst_75 : f32 to vector<8x1xf32>
    %195 = arith.divf %193, %194 : vector<8x1xf32>
    %196 = arith.mulf %191, %191 : vector<8x512xf32>
    %cst_76 = arith.constant dense<0.000000e+00> : vector<8xf32>
    %197 = vector.multi_reduction <add>, %196, %cst_76 [1] : vector<8x512xf32> to vector<8xf32>
    %198 = vector.shape_cast %197 : vector<8xf32> to vector<8x1xf32>
    %cst_77 = arith.constant 5.120000e+02 : f32
    %199 = vector.broadcast %cst_77 : f32 to vector<8x1xf32>
    %200 = arith.divf %198, %199 : vector<8x1xf32>
    %201 = arith.mulf %195, %195 : vector<8x1xf32>
    %202 = arith.subf %200, %201 : vector<8x1xf32>
    %cst_78 = arith.constant 0.000000e+00 : f32
    %203 = vector.broadcast %cst_78 : f32 to vector<8x1xf32>
    %204 = arith.maximumf %202, %203 : vector<8x1xf32>
    %c0_79 = arith.constant 0 : index
    %c0_80 = arith.constant 0 : index
    %205 = vector.load %arg8[%c0_79, %c0_80] : memref<8x1xf32, #tpu.memory_space<vmem>>, vector<8x1xf32>
    %cst_81 = arith.constant 9.99999974E-6 : f32
    %206 = vector.broadcast %cst_81 : f32 to vector<8x1xf32>
    %207 = arith.addf %204, %206 : vector<8x1xf32>
    %208 = math.rsqrt %207 : vector<8x1xf32>
    %209 = arith.mulf %205, %208 : vector<8x1xf32>
    %c0_82 = arith.constant 0 : index
    %c0_83 = arith.constant 0 : index
    %210 = vector.load %arg9[%c0_82, %c0_83] : memref<8x1xf32, #tpu.memory_space<vmem>>, vector<8x1xf32>
    %211 = arith.mulf %195, %209 : vector<8x1xf32>
    %212 = arith.subf %210, %211 : vector<8x1xf32>
    %213 = vector.broadcast %209 : vector<8x1xf32> to vector<8x512xf32>
    %214 = arith.mulf %191, %213 : vector<8x512xf32>
    %215 = vector.broadcast %212 : vector<8x1xf32> to vector<8x512xf32>
    %216 = arith.addf %214, %215 : vector<8x512xf32>
    %217 = arith.addf %216, %93 : vector<8x512xf32>
    %cst_84 = arith.constant 0.000000e+00 : f32
    %218 = vector.broadcast %cst_84 : f32 to vector<8x512xf32>
    %219 = arith.maximumf %217, %218 : vector<8x512xf32>
    %220 = vector.extract_strided_slice %219 {offsets = [0, 0], sizes = [8, 128], strides = [1, 1]} : vector<8x512xf32> to vector<8x128xf32>
    %221 = vector.extract_strided_slice %219 {offsets = [0, 128], sizes = [8, 128], strides = [1, 1]} : vector<8x512xf32> to vector<8x128xf32>
    %222 = arith.maximumf %220, %221 : vector<8x128xf32>
    %223 = vector.extract_strided_slice %219 {offsets = [0, 256], sizes = [8, 128], strides = [1, 1]} : vector<8x512xf32> to vector<8x128xf32>
    %224 = vector.extract_strided_slice %219 {offsets = [0, 384], sizes = [8, 128], strides = [1, 1]} : vector<8x512xf32> to vector<8x128xf32>
    %225 = arith.maximumf %223, %224 : vector<8x128xf32>
    %226 = arith.maximumf %222, %225 : vector<8x128xf32>
    %c0_85 = arith.constant 0 : index
    %c0_86 = arith.constant 0 : index
    %227 = vector.load %arg10[%c0_85, %c0_86] : memref<8x128xf32, #tpu.memory_space<vmem>>, vector<8x128xf32>
    tpu.vector_store %arg10[%c0_85, %c0_86], %226 {strides = array<i32>} : memref<8x128xf32, #tpu.memory_space<vmem>>, vector<8x128xf32>,
    return
  }
}

</mosaic_0001>

<bundles_post_ra>
// kernel: tpu_custom_call.1
= control target key start
LH: loop header
LB: loop body
LE: loop exit
PB: predicated region body
PF: predicated region fallthrough
CT: control target
= control target key end

     0   :  { %15 = vsyncpa [#allocation3], 0  ;;  %s1291_s0 = inlined_call_operand.vmem [shape: f32[4,8,128], index: 0, kind: input, shape index: {}]   ;;  %s1292_s1 = inlined_call_operand.hbm [shape: s32[1,128], index: 1, kind: input, shape index: {}]   ;;  %s1293_s2 = inlined_call_operand.hbm [shape: s32[1,128], index: 2, kind: input, shape index: {}]   ;;  %s1294_s3 = inlined_call_operand.vmem [shape: f32[16,72], index: 3, kind: input, shape index: {}]   ;;  %s1295_s4 = inlined_call_operand.vmem [shape: f32[8,1], index: 4, kind: input, shape index: {}]   ;;  %s1296_s5 = inlined_call_operand.vmem [shape: f32[8,1], index: 5, kind: input, shape index: {}]   ;;  %s1297_s6 = inlined_call_operand.vmem [shape: f32[8,1], index: 6, kind: input, shape index: {}]   ;;  %s1298_s7 = inlined_call_operand.vmem [shape: f32[8,72], index: 7, kind: input, shape index: {}]   ;;  %s1299_s8 = inlined_call_operand.vmem [shape: f32[8,1], index: 8, kind: input, shape index: {}]   ;;  %s1300_s9 = inlined_call_operand.vmem [shape: f32[8,1], index: 9, kind: input, shape index: {}]   ;;  %s1301_s10 = inlined_call_operand.hbm [shape: f32[8,128], index: 10, kind: output, shape index: {}]  }
   0x1   :  { %16 = vsyncpa [#allocation6], 0 }
   0x2   :  { %17 = vsyncpa [#allocation4], 0  ;;  %s876_s13 = smov [#allocation2]   ;;  %s877_s15 = smov [#allocation5]  }
   0x3   :  { %s26_s14 = sshll.u32 %s876_s13, 4  ;;  %s36_s16 = sshll.u32 %s877_s15, 4  ;;  %s27_s14 = int_to_ptr.vmem [resolvable:$true] %s26_s14  ;;  %s37_s16 = int_to_ptr.vmem [resolvable:$true] %s36_s16 }
   0x4   :  { %s804_s19 = scalar_lea.hbm %s1292_s1, 16 }
   0x5   :  { %p805_p0 = scmp.ne.s32.totalorder %s1292_s1, %s804_s19  ;;  %p808_p1 = scmp.lt.u32.totalorder %s804_s19, %s1292_s1 }
   0x7   :  { %p810_p2 = pnand %p808_p1, %p805_p0 }
   0x9   :  { %813 = shalt.err (!%p810_p2)
}
   0xa   :  { %s814_s24 = scalar_lea.vmem %s27_s14, 16  ;;  %s818_s25 = scalar_lea.vmem %s27_s14, 32 }
   0xb   :  { %p815_p3 = scmp.ne.s32.totalorder %s27_s14, %s814_s24  ;;  %p819_p4 = scmp.lt.s32.totalorder %s27_s14, %s27_s14 }
   0xc   :  { %p820_p5 = scmp.lt.s32.totalorder %s818_s25, %s814_s24 }
   0xe   :  { %p821_p6 = por %p820_p5, %p819_p4 }
  0x10   :  { %p822_p7 = pnand %p821_p6, %p815_p3 }
  0x12   :  { %825 = shalt.err (!%p822_p7)
}
  0x13   :  { %29 = dma.hbm_to_vmem [thread:$0]  %s1292_s1, 16, %s27_s14, [#allocation3]  }
  0x14   :  { %s826_s30 = scalar_lea.hbm %s1293_s2, 16 }
  0x15   :  { %p827_p8 = scmp.ne.s32.totalorder %s1293_s2, %s826_s30  ;;  %p830_p9 = scmp.lt.u32.totalorder %s826_s30, %s1293_s2 }
  0x17   :  { %p832_p10 = pnand %p830_p9, %p827_p8 }
  0x19   :  { %835 = shalt.err (!%p832_p10)
}
  0x1a   :  { %s836_s17 = scalar_lea.vmem %s37_s16, 16  ;;  %s840_s18 = scalar_lea.vmem %s37_s16, 32 }
  0x1b   :  { %p837_p11 = scmp.ne.s32.totalorder %s37_s16, %s836_s17  ;;  %p841_p12 = scmp.lt.s32.totalorder %s37_s16, %s37_s16 }
  0x1c   :  { %p842_p13 = scmp.lt.s32.totalorder %s840_s18, %s836_s17 }
  0x1e   :  { %p843_p0 = por %p842_p13, %p841_p12 }
  0x20   :  { %p844_p1 = pnand %p843_p0, %p837_p11 }
  0x22   :  { %847 = shalt.err (!%p844_p1)
}
  0x23   :  { %39 = dma.hbm_to_vmem [thread:$0]  %s1293_s2, 16, %s37_s16, [#allocation6]  }
  0x24   :  { %870 = dma.done.wait [#allocation3], 16  }
  0x25   :  { %871 = vsyncadd [#allocation3], 4294967280 }
  0x26   :  { %872 = dma.done.wait [#allocation6], 16  }
  0x27   :  { %873 = vsyncadd [#allocation6], 4294967280  ;;  %v878_v0 = vmov 0   ;;  %v974_v1 = vld [vmem:[%s1291_s0 + $0x8] sm:$0xff]  ;;  %v979_v2 = vld [vmem:[%s1291_s0 + $0x10] sm:$0xff]  ;;  %s879_s23 = smov 1   ;;  %v80_v8 = vlaneseq }
  0x28   :  { %793 = vset.pattern.permute.xlu0 %v878_v0  ;;  %794 = vset.pattern.permute.xlu1 %v878_v0  ;;  %v984_v3 = vld [vmem:[%s1291_s0 + $0x18] sm:$0xff]  ;;  %v993_v5 = vld [vmem:[%s1291_s0] sm:$0xff]  ;;  %s880_s26 = smov 8   ;;  %s881_s27 = smov 7   ;;  %v884_v7 = vmov 0.0   ;;  %vm888_vm7 = vmmov 1  }
  0x29   :  { %98 = vrot.lane.b32.xlu1 %v974_v1, %s879_s23  ;;  %v788_v4 = vpack.i.bf16 %v984_v3, %v979_v2  ;;  %v997_v6 = vpack.c.bf16 %v974_v1, %v993_v5  ;;  %s882_s28 = smov 9   ;;  %s883_s0 = smov 127   ;;  %234 = vmatprep.mubr.f32.mxu0 %v884_v7  ;;  %v61_v9 = vld [vmem:[#allocation5] sm:$0x1]  ;;  %v81_v10 = vshrl.u32 %v80_v8, 7  ;;  %v703_v56 = vpack.c.bf16 %v984_v3, %v979_v2 }
  0x2a   :  { %311 = vmatprep.mubr.f32.mxu1 %v884_v7  ;;  %s885_s29 = smov 120   ;;  %s886_s30 = smov 121   ;;  %v60_v11 = vld [vmem:[#allocation2] sm:$0x1]  ;;  %vm64_vm0 = vcmp.ge.s32.totalorder %v61_v9, 1  ;;  %vm65_vm2 = vcmp.lt.s32.totalorder %v61_v9, 7 }
  0x2b   :  { %789 = vrot.lane.b32.xlu0 %v788_v4, %s880_s26  ;;  %709 = vmatprep.subr.bf16.mxu1 %v997_v6  ;;  %s887_s11 = smov 119   ;;  %vm62_vm1 = vcmp.ge.s32.totalorder %v60_v11, 1  ;;  %v1021_v12 = vsub.s32 0, %v81_v10  ;;  %v100_v13 = vsel %vm64_vm0, 1, %v878_v0  ;;  %v121_v21 = vsel %vm65_vm2, 1, %v878_v0  ;;  %v354_v32 = vld [vmem:[%s1296_s5] sm:$0xff] }
  0x2c   :  { %vm66_vm3 = vmand %vm62_vm1, %vm64_vm0  ;;  %v88_v15 = vsel %vm62_vm1, 1, %v878_v0  ;;  %vm63_vm6 = vcmp.lt.s32.totalorder %v60_v11, 7  ;;  %v419_v41 = vld [vmem:[%s1298_s7] sm:$0xff] }
  0x2d   :  { %110 = vrot.lane.b32.xlu1 %v979_v2, %s881_s27  ;;  %v104_v14 = vrot.slane %v100_v13, %v1021_v12  ;;  %vm67_vm4 = vmand %vm62_vm1, %vm65_vm2  ;;  %v79_v16 = vsel %vm66_vm3, 1, %v878_v0  ;;  %v92_v18 = vrot.slane %v88_v15, %v1021_v12  ;;  %v125_v27 = vrot.slane %v121_v21, %v1021_v12 }
  0x2e   :  { %v112_v17 = vsel %vm67_vm4, 1, %v878_v0  ;;  %v83_v20 = vrot.slane %v79_v16, %v1021_v12  ;;  %vm1061_vm12 = vmand %vm63_vm6, %vm64_vm0  ;;  %v142_v42 = vsel %vm63_vm6, 1, %v878_v0 }
  0x2f   :  { %77 = vrot.lane.b32.xlu0 %v984_v3, %s882_s28  ;;  %vm1032_vm5 = vcmp.eq.s32.totalorder %v104_v14, 1  ;;  %v116_v22 = vrot.slane %v112_v17, %v1021_v12  ;;  %vm1048_vm9 = vcmp.eq.s32.totalorder %v92_v18, 1  ;;  %vm1072_vm15 = vcmp.eq.s32.totalorder %v125_v27, 1 }
  0x30   :  { %vm1043_vm8 = vmpackc.low %vm888_vm7, %vm1032_vm5  ;;  %vm1053_vm10 = vcmp.eq.s32.totalorder %v83_v20, 1  ;;  %v133_v44 = vsel %vm1061_vm12, 1, %v878_v0  ;;  %v146_v51 = vrot.slane %v142_v42, %v1021_v12 }
  0x31   :  { %107 = vrot.lane.b32.xlu1 %v984_v3, %s879_s23  ;;  %vm117_vm11 = vcmp.eq.s32.totalorder %v116_v22, 1  ;;  %vm687_vm13 = vmpackc.low %vm1048_vm9, %vm1048_vm9  ;;  %v137_v53 = vrot.slane %v133_v44, %v1021_v12 }
  0x32   :  { %vm1302_vm14 = vmpackc.low %vm1048_vm9, %vm1053_vm10 }
  0x33   :  { %119 = vrot.lane.b32.xlu0 %v993_v5, %s883_s0  ;;  %vm1078_vm0 = vmpackc.low %vm888_vm7, %vm117_vm11 }
  0x34   :  { %vm1303_vm1 = vmpackc.low %vm1032_vm5, %vm1048_vm9 }
  0x35   :  { %140 = vrot.lane.b32.xlu1 %v993_v5, %s885_s29  ;;  %vm1094_vm3 = vmpackc.low %vm888_vm7, %vm1072_vm15 }
  0x36   :  { %vm1108_vm4 = vmpackc.low %vm1032_vm5, %vm888_vm7 }
  0x37   :  { %128 = vrot.lane.b32.xlu0 %v979_v2, %s883_s0  ;;  %vm69_vm11 = vmand %vm63_vm6, %vm65_vm2  ;;  %vm1146_vm2 = vcmp.eq.s32.totalorder %v146_v51, 1  ;;  %vm1150_vm6 = vcmp.eq.s32.totalorder %v137_v53, 1 }
  0x38   :  { %v154_v54 = vsel %vm69_vm11, 1, %v878_v0  ;;  %vm1304_vm12 = vmpackc.low %vm1146_vm2, %vm1150_vm6 }
  0x39   :  { %131 = vrot.lane.b32.xlu1 %v974_v1, %s886_s30  ;;  %v158_v60 = vrot.slane %v154_v54, %v1021_v12 }
  0x3b   :  { %149 = vrot.lane.b32.xlu0 %v974_v1, %s885_s29  ;;  %vm1166_vm11 = vcmp.eq.s32.totalorder %v158_v60, 1 }
  0x3f   :  { %152 = vrot.lane.b32.xlu0 %v993_v5, %s887_s11 }
  0x9b   :  { %v99_v23 = vpop.permute.xlu1 %98 }
  0x9c   :  { %v710_v25 = vpack.c.bf16 %v993_v5, %v99_v23 }
  0x9d   :  { %v790_v28 = vpop.permute.xlu0 %789 }
  0x9e   :  { %v792_v30 = vunpack.i.h.bf16 %v790_v28  ;;  %v791_v31 = vunpack.i.l.bf16 %v790_v28  ;;  %712 = vmatpush1.bf16.msk.msra.mxu1 %vm1043_vm8, %v710_v25 }
  0x9f   :  { %v111_v33 = vpop.permute.xlu1 %110 }
  0xa0   :  { %v686_v34 = vpack.c.bf16 %v792_v30, %v791_v31  ;;  %v692_v36 = vpack.c.bf16 %v993_v5, %v111_v33  ;;  %v695_v47 = vpack.c.bf16 %v99_v23, %v792_v30  ;;  %v161_v5 = vld [vmem:[%s1294_s3] sm:$0xff] }
  0xa1   :  { %v78_v37 = vpop.permute.xlu0 %77 }
  0xa2   :  { %v689_v39 = vpack.c.bf16 %v791_v31, %v78_v37  ;;  %688 = vmatprep.subr.msk.bf16.mxu0 %vm687_vm13, %v686_v34 }
  0xa3   :  { %v108_v40 = vpop.permute.xlu1 %107 }
  0xa4   :  { %691 = vmatpush1.bf16.msk.msra.mxu0 %vm1302_vm14, %v689_v39  ;;  %v716_v45 = vpack.c.bf16 %v108_v40, %v974_v1  ;;  %vm1125_vm14 = vmpackc.low %vm1072_vm15, %vm888_vm7  ;;  %v705_v63 = vpack.c.bf16 %v979_v2, %v108_v40 }
  0xa5   :  { %v120_v46 = vpop.permute.xlu0 %119  ;;  %694 = vmatprep.subr.msk.bf16.mxu0 %vm1078_vm0, %v692_v36  ;;  %vm725_vm7 = vmpackc.low %vm1146_vm2, %vm1146_vm2  ;;  %v358_v36 = vld [vmem:[%s1297_s6] sm:$0xff] }
  0xa6   :  { %v698_v48 = vpack.c.bf16 %v120_v46, %v974_v1  ;;  %v713_v49 = vpack.c.bf16 %v979_v2, %v120_v46 }
  0xa7   :  { %v141_v52 = vpop.permute.xlu1 %140 }
  0xa8   :  { %697 = vmatpush1.bf16.msk.msra.mxu0 %vm1303_vm1, %v695_v47  ;;  %715 = vmatprep.subr.msk.bf16.mxu1 %vm1094_vm3, %v713_v49  ;;  %vm163_vm1 = vcmask 588800  }
  0xa9   :  { %v129_v55 = vpop.permute.xlu0 %128  ;;  %718 = vmatpush1.bf16.msk.msra.mxu1 %vm1108_vm4, %v716_v45  ;;  %700 = vmatprep.subr.msk.bf16.mxu0 %vm1125_vm14, %v698_v48 }
  0xaa   :  { %v719_v57 = vpack.c.bf16 %v129_v55, %v984_v3 }
  0xab   :  { %v132_v61 = vpop.permute.xlu1 %131 }
  0xac   :  { %702 = vmatpush1.bf16.msra.mxu0 %v997_v6  ;;  %721 = vmatprep.subr.msk.bf16.mxu1 %vm1125_vm14, %v719_v57  ;;  %v727_v1 = vpack.c.bf16 %v141_v52, %v132_v61  ;;  %v162_v61 = vld [vmem:[%s1294_s3 + $0x8] sm:$0xff] }
  0xad   :  { %v150_v62 = vpop.permute.xlu0 %149  ;;  %723 = vmatpush1.bf16.msra.mxu1 %v703_v56  ;;  %704 = vmatprep.subr.bf16.mxu0 %v703_v56 }
  0xae   :  { %v724_v0 = vpack.c.bf16 %v150_v62, %v141_v52 }
  0xb0   :  { %707 = vmatpush1.bf16.msk.msra.mxu0 %vm1043_vm8, %v705_v63  ;;  %726 = vmatprep.subr.msk.bf16.mxu1 %vm725_vm7, %v724_v0 }
  0xb1   :  { %649 = vmatprep.subr.msk.mxu0 %vm1072_vm15, %v129_v55  ;;  %729 = vmatpush1.bf16.msk.msra.mxu1 %vm1304_vm12, %v727_v1  ;;  %v153_v2 = vpop.permute.xlu0 %152  ;;  %vm1331_vm12 = vmpackc.low %vm1048_vm9, %vm1053_vm10 }
  0xb2   :  { %660 = vmatprep.subr.msk.mxu1 %vm1166_vm11, %v153_v2 }
  0xb4   :  { %187 = vmatpush1.msra.mxu0 %v984_v3 }
  0xb5   :  { %650 = vmatmul.mubr.msk.f32.vlgmr.msra.gmra.mrb[0].mxu0 %vm163_vm1, %v161_v5  ;;  %661 = vmatpush1.msk.msra.mxu1 %vm1146_vm2, %v150_v62 }
  0xb6   :  { %662 = vmatmul.mubr.msk.f32.vlgmr.msra.gmra.mrb[0].mxu1 %vm163_vm1, %v161_v5  ;;  %240 = vmatprep.mubr.f32.mxu0 %v884_v7 }
  0xb7   :  { %317 = vmatprep.mubr.f32.mxu1 %v884_v7 }
  0xb9   :  { %651 = vmatmul.mubr.msk.f32.gmra.mrb[2].mxu0 %vm163_vm1, %v162_v61 }
  0xba   :  { %663 = vmatmul.mubr.msk.f32.gmra.mrb[2].mxu1 %vm163_vm1, %v162_v61  ;;  %487 = vmatprep.mubr.f32.mxu0 %v884_v7 }
  0xbb   :  { %558 = vmatprep.mubr.f32.mxu1 %v884_v7 }
 0x188   :  { %v236_v6 = vpop.f32.mrb[0].mxu0 }
 0x189   :  { %v341_v8 = vmul.f32 %v236_v6, %v236_v6  ;;  %v238_v9 = vpop.f32.mrb[1].mxu0  ;;  %v313_v10 = vpop.f32.mrb[0].mxu1 }
 0x18a   :  { %v334_v11 = vadd.f32 %v238_v9, %v236_v6  ;;  %v342_v12 = vmul.f32 %v238_v9, %v238_v9  ;;  %v343_v13 = vmul.f32 %v313_v10, %v313_v10  ;;  %v315_v14 = vpop.f32.mrb[1].mxu1 }
 0x18b   :  { %v344_v17 = vmul.f32 %v315_v14, %v315_v14 }
 0x18c   :  { %v335_v3 = vadd.f32 %v334_v11, %v313_v10  ;;  %v345_v15 = vadd.f32 %v342_v12, %v341_v8  ;;  %v242_v50 = vpop.f32.mrb[2].mxu0 }
 0x18e   :  { %v336_v16 = vadd.f32 %v335_v3, %v315_v14  ;;  %v346_v18 = vadd.f32 %v345_v15, %v343_v13 }
 0x190   :  { %337 = vadd.xlane.f32.xlu1 %v336_v16  ;;  %v347_v20 = vadd.f32 %v346_v18, %v344_v17  ;;  %v319_v18 = vpop.f32.mrb[2].mxu1 }
 0x192   :  { %348 = vadd.xlane.f32.xlu0 %v347_v20  ;;  %v244_v20 = vpop.f32.mrb[3].mxu0 }
 0x21d   :  { %v338_v21 = vpop.xlane.xlu1 %337 }
 0x21e   :  { %v340_v22 = vmul.f32 0.001953125, %v338_v21  ;;  %v321_v21 = vpop.f32.mrb[3].mxu1 }
 0x21f   :  { %v349_v23 = vpop.xlane.xlu0 %348 }
 0x220   :  { %v351_v25 = vmul.f32 %v340_v22, %v340_v22  ;;  %v350_v27 = vmul.f32 0.001953125, %v349_v23 }
 0x222   :  { %v352_v28 = vsub.f32 %v350_v27, %v351_v25 }
 0x224   :  { %v353_v30 = vmax.f32 %v352_v28, 0.0 }
 0x226   :  { %v355_v31 = vadd.f32 1e-05, %v353_v30 }
 0x228   :  { %800 = vrsqrt.f32 %v355_v31 }
 0x232   :  { %v801_v33 = vpop.eup %800 }
 0x233   :  { %v357_v34 = vmul.f32 %v801_v33, %v354_v32 }
 0x235   :  { %363 = vperm.xlu0 %793, %v357_v34   ;;  %v359_v37 = vmul.f32 %v357_v34, %v340_v22 }
 0x237   :  { %v360_v39 = vsub.f32 %v358_v36, %v359_v37  ;;  %v324_v37 = vld [vmem:[%s1295_s4] sm:$0xff]  ;;  %s889_s4 = smov [#allocation7]  }
 0x239   :  { %372 = vperm.xlu1 %794, %v360_v39  }
 0x2b4   :  { %v364_v40 = vpop.permute.xlu0 %363 }
 0x2b5   :  { %v366_v42 = vmul.f32 %v364_v40, %v236_v6  ;;  %v367_v44 = vmul.f32 %v364_v40, %v238_v9  ;;  %v368_v45 = vmul.f32 %v364_v40, %v313_v10  ;;  %v369_v46 = vmul.f32 %v364_v40, %v315_v14 }
 0x2b8   :  { %v373_v47 = vpop.permute.xlu1 %372 }
 0x2b9   :  { %v375_v48 = vadd.f32 %v373_v47, %v366_v42  ;;  %v376_v49 = vadd.f32 %v373_v47, %v367_v44  ;;  %v377_v51 = vadd.f32 %v373_v47, %v368_v45  ;;  %v378_v52 = vadd.f32 %v373_v47, %v369_v46 }
 0x2bb   :  { %v379_v53 = vmax.f32 %v375_v48, 0.0  ;;  %v380_v54 = vmax.f32 %v376_v49, 0.0  ;;  %v381_v55 = vmax.f32 %v377_v51, 0.0  ;;  %v382_v56 = vmax.f32 %v378_v52, 0.0  ;;  %v584_v49 = vld [vmem:[%s1299_s8] sm:$0xff]  ;;  %s627_s8 = sshll.u32 %s889_s4, 4  ;;  %s628_s8 = int_to_ptr.vmem [resolvable:$true] %s627_s8 }
 0x2bc   :  { %p853_p3 = scmp.lt.s32.totalorder %s628_s8, %s628_s8 }
 0x2bd   :  { %410 = vrot.lane.b32.xlu0 %v379_v53, %s885_s29  ;;  %v795_v57 = vpack.i.bf16 %v382_v56, %v381_v55  ;;  %v745_v60 = vpack.c.bf16 %v380_v54, %v379_v53  ;;  %v747_v13 = vpack.c.bf16 %v382_v56, %v381_v55 }
 0x2bf   :  { %796 = vrot.lane.b32.xlu1 %v795_v57, %s880_s26  ;;  %753 = vmatprep.subr.bf16.mxu1 %v745_v60 }
 0x2c1   :  { %407 = vrot.lane.b32.xlu0 %v380_v54, %s886_s30 }
 0x2c3   :  { %383 = vrot.lane.b32.xlu1 %v382_v56, %s882_s28 }
 0x2c7   :  { %392 = vrot.lane.b32.xlu1 %v380_v54, %s879_s23 }
 0x2cb   :  { %398 = vrot.lane.b32.xlu1 %v381_v55, %s881_s27 }
 0x2cf   :  { %401 = vrot.lane.b32.xlu1 %v379_v53, %s883_s0 }
 0x2d3   :  { %395 = vrot.lane.b32.xlu1 %v382_v56, %s879_s23 }
 0x2d7   :  { %404 = vrot.lane.b32.xlu1 %v381_v55, %s883_s0 }
 0x2db   :  { %413 = vrot.lane.b32.xlu1 %v380_v54, %s885_s29 }
 0x2df   :  { %416 = vrot.lane.b32.xlu1 %v379_v53, %s887_s11 }
 0x32f   :  { %v411_v38 = vpop.permute.xlu0 %410 }
 0x331   :  { %v797_v62 = vpop.permute.xlu1 %796 }
 0x332   :  { %v799_v63 = vunpack.i.h.bf16 %v797_v62  ;;  %v798_v0 = vunpack.i.l.bf16 %v797_v62 }
 0x333   :  { %v408_v16 = vpop.permute.xlu0 %407 }
 0x334   :  { %v730_v1 = vpack.c.bf16 %v799_v63, %v798_v0  ;;  %v771_v24 = vpack.c.bf16 %v411_v38, %v408_v16 }
 0x335   :  { %v384_v2 = vpop.permute.xlu1 %383 }
 0x336   :  { %v733_v5 = vpack.c.bf16 %v798_v0, %v384_v2  ;;  %732 = vmatprep.subr.msk.bf16.mxu0 %vm687_vm13, %v730_v1  ;;  %vm1332_vm13 = vmpackc.low %vm1032_vm5, %vm1048_vm9 }
 0x337   :  { %vm1333_vm5 = vmpackc.low %vm1146_vm2, %vm1150_vm6 }
 0x338   :  { %735 = vmatpush1.bf16.msk.msra.mxu0 %vm1331_vm12, %v733_v5 }
 0x339   :  { %v393_v7 = vpop.permute.xlu1 %392 }
 0x33a   :  { %v754_v6 = vpack.c.bf16 %v379_v53, %v393_v7  ;;  %v739_v10 = vpack.c.bf16 %v393_v7, %v799_v63 }
 0x33c   :  { %756 = vmatpush1.bf16.msk.msra.mxu1 %vm1043_vm8, %v754_v6 }
 0x33d   :  { %v399_v8 = vpop.permute.xlu1 %398 }
 0x33e   :  { %v736_v9 = vpack.c.bf16 %v379_v53, %v399_v8  ;;  %v588_v53 = vld [vmem:[%s1300_s9] sm:$0xff]  ;;  %s848_s9 = scalar_lea.vmem %s628_s8, 128 }
 0x33f   :  { %p849_p2 = scmp.ne.s32.totalorder %s628_s8, %s848_s9  ;;  %p854_p4 = scmp.lt.s32.totalorder %s848_s9, %s848_s9 }
 0x340   :  { %738 = vmatprep.subr.msk.bf16.mxu0 %vm1078_vm0, %v736_v9 }
 0x341   :  { %v402_v11 = vpop.permute.xlu1 %401  ;;  %741 = vmatpush1.bf16.msk.msra.mxu0 %vm1332_vm13, %v739_v10  ;;  %p855_p5 = por %p854_p4, %p853_p3 }
 0x342   :  { %v742_v29 = vpack.c.bf16 %v402_v11, %v380_v54  ;;  %v757_v12 = vpack.c.bf16 %v381_v55, %v402_v11 }
 0x343   :  { %p856_p6 = pnand %p855_p5, %p849_p2 }
 0x344   :  { %744 = vmatprep.subr.msk.bf16.mxu0 %vm1125_vm14, %v742_v29  ;;  %759 = vmatprep.subr.msk.bf16.mxu1 %vm1094_vm3, %v757_v12 }
 0x345   :  { %v396_v14 = vpop.permute.xlu1 %395  ;;  %746 = vmatpush1.bf16.msra.mxu0 %v745_v60 }
 0x346   :  { %v749_v3 = vpack.c.bf16 %v381_v55, %v396_v14  ;;  %v760_v15 = vpack.c.bf16 %v396_v14, %v380_v54  ;;  %748 = vmatprep.subr.bf16.mxu0 %v747_v13 }
 0x348   :  { %762 = vmatpush1.bf16.msk.msra.mxu1 %vm1108_vm4, %v760_v15 }
 0x349   :  { %v405_v19 = vpop.permute.xlu1 %404  ;;  %751 = vmatpush1.bf16.msk.msra.mxu0 %vm1043_vm8, %v749_v3 }
 0x34a   :  { %v763_v26 = vpack.c.bf16 %v405_v19, %v382_v56  ;;  %673 = vmatprep.subr.msk.mxu0 %vm1072_vm15, %v405_v19 }
 0x34c   :  { %765 = vmatprep.subr.msk.bf16.mxu1 %vm1125_vm14, %v763_v26 }
 0x34d   :  { %v414_v17 = vpop.permute.xlu1 %413  ;;  %440 = vmatpush1.msra.mxu0 %v382_v56  ;;  %767 = vmatpush1.bf16.msra.mxu1 %v747_v13 }
 0x34e   :  { %v768_v43 = vpack.c.bf16 %v414_v17, %v411_v38  ;;  %674 = vmatmul.mubr.msk.f32.vlgmr.msra.gmra.mrb[4].mxu0 %vm163_vm1, %v419_v41 }
 0x350   :  { %770 = vmatprep.subr.msk.bf16.mxu1 %vm725_vm7, %v768_v43 }
 0x351   :  { %v417_v35 = vpop.permute.xlu1 %416  ;;  %773 = vmatpush1.bf16.msk.msra.mxu1 %vm1333_vm5, %v771_v24 }
 0x352   :  { %683 = vmatprep.subr.msk.mxu1 %vm1166_vm11, %v417_v35 }
 0x355   :  { %684 = vmatpush1.msk.msra.mxu1 %vm1146_vm2, %v414_v17 }
 0x356   :  { %685 = vmatmul.mubr.msk.f32.vlgmr.msra.gmra.mrb[4].mxu1 %vm163_vm1, %v419_v41 }
 0x421   :  { %v489_v22 = vpop.f32.mrb[4].mxu0 }
 0x422   :  { %v571_v23 = vmul.f32 %v489_v22, %v489_v22  ;;  %v491_v25 = vpop.f32.mrb[5].mxu0 }
 0x423   :  { %v565_v27 = vadd.f32 %v491_v25, %v489_v22  ;;  %v572_v28 = vmul.f32 %v491_v25, %v491_v25 }
 0x425   :  { %v575_v59 = vadd.f32 %v572_v28, %v571_v23 }
 0x429   :  { %v560_v30 = vpop.f32.mrb[4].mxu1 }
 0x42a   :  { %v573_v31 = vmul.f32 %v560_v30, %v560_v30  ;;  %v562_v32 = vpop.f32.mrb[5].mxu1  ;;  %v566_v4 = vadd.f32 %v565_v27, %v560_v30 }
 0x42b   :  { %v574_v33 = vmul.f32 %v562_v32, %v562_v32 }
 0x42c   :  { %v567_v34 = vadd.f32 %v566_v4, %v562_v32  ;;  %v576_v58 = vadd.f32 %v575_v59, %v573_v31 }
 0x42e   :  { %568 = vadd.xlane.f32.xlu0 %v567_v34  ;;  %v577_v36 = vadd.f32 %v576_v58, %v574_v33 }
 0x430   :  { %578 = vadd.xlane.f32.xlu1 %v577_v36 }
 0x441   :  { %327 = vperm.xlu1 %794, %v324_v37  }
 0x4bb   :  { %v569_v39 = vpop.xlane.xlu0 %568 }
 0x4bc   :  { %v570_v40 = vmul.f32 0.001953125, %v569_v39 }
 0x4bd   :  { %v579_v42 = vpop.xlane.xlu1 %578 }
 0x4be   :  { %v581_v44 = vmul.f32 %v570_v40, %v570_v40  ;;  %v580_v45 = vmul.f32 0.001953125, %v579_v42 }
 0x4c0   :  { %v582_v46 = vsub.f32 %v580_v45, %v581_v44 }
 0x4c1   :  { %v328_v57 = vpop.permute.xlu1 %327 }
 0x4c2   :  { %v583_v47 = vmax.f32 %v582_v46, 0.0  ;;  %v330_v0 = vadd.f32 %v328_v57, %v242_v50  ;;  %v331_v1 = vadd.f32 %v328_v57, %v244_v20  ;;  %v332_v2 = vadd.f32 %v328_v57, %v319_v18 }
 0x4c3   :  { %v333_v5 = vadd.f32 %v328_v57, %v321_v21 }
 0x4c4   :  { %v585_v48 = vadd.f32 1e-05, %v583_v47 }
 0x4c6   :  { %802 = vrsqrt.f32 %v585_v48 }
 0x4d0   :  { %v803_v51 = vpop.eup %802 }
 0x4d1   :  { %v587_v52 = vmul.f32 %v803_v51, %v584_v49 }
 0x4d3   :  { %593 = vperm.xlu0 %793, %v587_v52   ;;  %v589_v54 = vmul.f32 %v587_v52, %v570_v40 }
 0x4d5   :  { %v590_v55 = vsub.f32 %v588_v53, %v589_v54 }
 0x4d7   :  { %602 = vperm.xlu0 %793, %v590_v55  }
 0x552   :  { %v594_v56 = vpop.permute.xlu0 %593 }
 0x553   :  { %v596_v60 = vmul.f32 %v594_v56, %v489_v22  ;;  %v597_v61 = vmul.f32 %v594_v56, %v491_v25  ;;  %v598_v62 = vmul.f32 %v594_v56, %v560_v30  ;;  %v599_v63 = vmul.f32 %v594_v56, %v562_v32 }
 0x556   :  { %v603_v7 = vpop.permute.xlu0 %602 }
 0x557   :  { %v605_v6 = vadd.f32 %v603_v7, %v596_v60  ;;  %v606_v8 = vadd.f32 %v603_v7, %v597_v61  ;;  %v607_v9 = vadd.f32 %v603_v7, %v598_v62  ;;  %v608_v10 = vadd.f32 %v603_v7, %v599_v63 }
 0x559   :  { %v609_v11 = vadd.f32 %v605_v6, %v330_v0  ;;  %v610_v29 = vadd.f32 %v606_v8, %v331_v1  ;;  %v611_v12 = vadd.f32 %v607_v9, %v332_v2  ;;  %v612_v13 = vadd.f32 %v608_v10, %v333_v5 }
 0x55b   :  { %v613_v14 = vmax.f32 %v609_v11, 0.0  ;;  %v614_v38 = vmax.f32 %v610_v29, 0.0  ;;  %v615_v3 = vmax.f32 %v611_v12, 0.0  ;;  %v616_v15 = vmax.f32 %v612_v13, 0.0 }
 0x55d   :  { %v617_v19 = vmax.f32 %v613_v14, %v614_v38  ;;  %v618_v26 = vmax.f32 %v615_v3, %v616_v15 }
 0x55f   :  { %v619_v41 = vmax.f32 %v617_v19, %v618_v26 }
 0x561   :  { %620 = vst [vmem:[#allocation7] sm:$0xff] %v619_v41 }
 0x562   :  { %859 = shalt.err (!%p856_p6)
}
 0x563   :  { %s860_s24 = scalar_lea.hbm %s1301_s10, 128 }
 0x564   :  { %p861_p7 = scmp.ne.s32.totalorder %s1301_s10, %s860_s24  ;;  %p864_p8 = scmp.lt.u32.totalorder %s860_s24, %s1301_s10 }
 0x566   :  { %p866_p9 = pnand %p864_p8, %p861_p7 }
 0x568   :  { %869 = shalt.err (!%p866_p9)
}
 0x569   :  { %630 = dma.vmem_to_hbm [thread:$0]  %s628_s8, 128, %s1301_s10, [#allocation4]  }
 0x56a   :  { %874 = dma.done.wait [#allocation4], 128  }
 0x56b   :  { %875 = vsyncadd [#allocation4], 4294967168 }
 0x56c   :  { %634 = vsyncpa [#allocation3], 1 }
 0x56d   :  { %635 = vsyncpa [#allocation6], 1 }
 0x56e   :  { %636 = vsyncpa [#allocation4], 1 }

</bundles_post_ra>
